<compile_context>
chip_gen: v6e
topology: v6e:2x2x1
jax: 0.10.0
libtpu: 0.0.40
codegen_flags: <defaults>
</compile_context>

<pallas_src>
import functools

import jax
import jax.numpy as jnp
from jax.experimental import pallas as pl
from jax.experimental.pallas import tpu as pltpu

BN_EPS = 1e-5
LEAKY_SLOPE = 0.01


def _round_up(n, m):
    return ((n + m - 1) // m) * m


def _bn_leaky(h, gamma, beta):
    """Training-mode BatchNorm1d (batch stats over axis 0) folded into a
    per-feature scale/shift, then LeakyReLU.  All math in f32; rsqrt goes to
    the EUP slot."""
    mean = jnp.mean(h, axis=0, keepdims=True)
    c = h - mean
    var = jnp.mean(c * c, axis=0, keepdims=True)
    scale = gamma * jax.lax.rsqrt(var + BN_EPS)   # EUP
    shift = beta - mean * scale
    y = h * scale + shift
    return jnp.where(y >= 0, y, LEAKY_SLOPE * y)


def model1_kernel(x_ref, w12_ref, w34_ref, w5_ref, vec_ref, out_ref):
    mm_dtype = w12_ref.dtype
    in_size = w12_ref.shape[0]
    out_pad = w5_ref.shape[1]

    # Packed per-feature vectors (one aligned VMEM tile, one DMA):
    #   rows 0..4 = gamma1, beta1, gamma2, beta2, b5 (lane-padded with zeros).
    g1 = vec_ref[0:1, :in_size]
    be1 = vec_ref[1:2, :in_size]
    g2 = vec_ref[2:3, :in_size]
    be2 = vec_ref[3:4, :in_size]
    b5 = vec_ref[4:5, :out_pad]

    # Block 1: fused Linear∘Linear (biases cancel under training-mode BN),
    # then BN (scale/shift) + LeakyReLU.  f32 accumulation on the MXU.
    h = jnp.dot(x_ref[...], w12_ref[...], preferred_element_type=jnp.float32)
    h = _bn_leaky(h, g1, be1)

    # Block 2: same structure.
    h = jnp.dot(h.astype(mm_dtype), w34_ref[...],
                preferred_element_type=jnp.float32)
    h = _bn_leaky(h, g2, be2)

    # Output projection (its bias survives — no BN after it).  Output columns
    # are padded to 128 so the final store is an unmasked, lane-dense vst.
    h = jnp.dot(h.astype(mm_dtype), w5_ref[...],
                preferred_element_type=jnp.float32) + b5
    out_ref[...] = h.astype(out_ref.dtype)


def prepare_params(params, *, matmul_dtype=jnp.bfloat16):
    """One-time preparation, hoisted out of the per-call path.

    * Fuses the two Linear-Linear pairs: (x@W1+b1)@W2+b2 == x@(W1@W2) + const;
      training-mode BN subtracts the per-feature batch mean right after, so the
      constant bias cancels exactly and is dropped.
    * Pads ONLY the final output dim to 128 lanes (unmasked output store);
      hidden/K dims stay at in_size.
    * Packs all per-feature 1-row vectors into a single (8, width) f32 tile.
    * Casts matmul operands once to `matmul_dtype` (default bf16).
    """
    in_size = params["w1"].shape[0]
    out_size = params["w5"].shape[1]
    out_pad = max(_round_up(out_size, 128), 128)
    vec_w = max(in_size, out_pad)

    hp = jax.lax.Precision.HIGHEST
    w12 = jnp.dot(params["w1"], params["w2"], precision=hp).astype(matmul_dtype)
    w34 = jnp.dot(params["w3"], params["w4"], precision=hp).astype(matmul_dtype)
    # b1/b2/b3/b4 intentionally dropped: exactly cancelled by training-mode BN.
    # TODO(synk): eval-mode BatchNorm (running stats) would NOT cancel these
    # biases — this prepared form is training-mode only.

    w5 = jnp.pad(params["w5"],
                 ((0, 0), (0, out_pad - out_size))).astype(matmul_dtype)

    def row(v, width):
        v = v.reshape(1, -1).astype(jnp.float32)
        return jnp.pad(v, ((0, 0), (0, width - v.shape[1])))

    vec = jnp.concatenate(
        [row(params["g1"], vec_w), row(params["be1"], vec_w),
         row(params["g2"], vec_w), row(params["be2"], vec_w),
         row(params["b5"], vec_w), jnp.zeros((3, vec_w), jnp.float32)],
        axis=0)

    return dict(w12=w12, w34=w34, w5=w5, vec=vec), out_size


@functools.partial(jax.jit, static_argnames=("out_size",))
def model1_forward(x, w12, w34, w5, vec, *, out_size):
    """Jitted forward: the x cast, the Pallas call and the output slice fuse
    into one executable; all weight prep is cached in prepare_params()."""
    batch, in_size = x.shape
    out_pad = w5.shape[1]
    mm_dtype = w12.dtype
    itemsize = jnp.dtype(mm_dtype).itemsize

    cost = pl.CostEstimate(
        flops=2 * batch * (2 * in_size * in_size + in_size * out_pad),
        transcendentals=2 * in_size,  # per-feature rsqrt, two BN layers
        bytes_accessed=(batch * in_size * itemsize           # x
                        + 2 * in_size * in_size * itemsize   # w12, w34
                        + in_size * out_pad * itemsize       # w5
                        + vec.size * 4                       # packed vectors
                        + batch * out_pad * 4))              # out (f32)

    vmem = pl.BlockSpec(memory_space=pltpu.MemorySpace.VMEM)

    # TODO(synk): for large batches, switch to a grid over batch tiles with
    # dimension_semantics=("parallel",) (so v7x's 2 TensorCores both run),
    # a two-pass BatchNorm (stats pass dividing by the TRUE row count, then
    # a normalize pass), and pick the batch tile against v7x's 64 MiB VMEM
    # budget via pltpu.CompilerParams(vmem_limit_bytes=...), not v6e's 128 MiB.
    out_p = pl.pallas_call(
        model1_kernel,
        out_shape=jax.ShapeDtypeStruct((batch, out_pad), jnp.float32),
        in_specs=[vmem] * 5,
        out_specs=vmem,
        cost_estimate=cost,
    )(x.astype(mm_dtype), w12, w34, w5, vec)

    return out_p[:, :out_size]


def init_params(key, in_size, out_size):
    """Deterministic PyTorch-style (uniform ±1/sqrt(fan_in)) init, transposed W."""
    ks = jax.random.split(key, 10)

    def lin(kw, kb, fan_in, fan_out):
        bound = 1.0 / jnp.sqrt(jnp.float32(fan_in))
        w = jax.random.uniform(kw, (fan_in, fan_out), jnp.float32, -bound, bound)
        b = jax.random.uniform(kb, (1, fan_out), jnp.float32, -bound, bound)
        return w, b

    w1, b1 = lin(ks[0], ks[1], in_size, in_size)
    w2, b2 = lin(ks[2], ks[3], in_size, in_size)
    w3, b3 = lin(ks[4], ks[5], in_size, in_size)
    w4, b4 = lin(ks[6], ks[7], in_size, in_size)
    w5, b5 = lin(ks[8], ks[9], in_size, out_size)
    return dict(
        w1=w1, b1=b1, w2=w2, b2=b2,
        g1=jnp.ones((1, in_size), jnp.float32),
        be1=jnp.zeros((1, in_size), jnp.float32),
        w3=w3, b3=b3, w4=w4, b4=b4,
        g2=jnp.ones((1, in_size), jnp.float32),
        be2=jnp.zeros((1, in_size), jnp.float32),
        w5=w5, b5=b5,
    )


def reference_forward(x, p):
    """Plain-JAX reference of the ORIGINAL (un-fused, with all biases) module."""
    h = x @ p["w1"] + p["b1"]
    h = h @ p["w2"] + p["b2"]
    m = h.mean(0, keepdims=True); v = ((h - m) ** 2).mean(0, keepdims=True)
    h = (h - m) / jnp.sqrt(v + BN_EPS) * p["g1"] + p["be1"]
    h = jnp.where(h >= 0, h, LEAKY_SLOPE * h)
    h = h @ p["w3"] + p["b3"]
    h = h @ p["w4"] + p["b4"]
    m = h.mean(0, keepdims=True); v = ((h - m) ** 2).mean(0, keepdims=True)
    h = (h - m) / jnp.sqrt(v + BN_EPS) * p["g2"] + p["be2"]
    h = jnp.where(h >= 0, h, LEAKY_SLOPE * h)
    return h @ p["w5"] + p["b5"]


if __name__ == "__main__":
    in_size, out_size, batch = 32, 16, 8
    key = jax.random.PRNGKey(0)
    kx, kp = jax.random.split(key)
    x = jax.random.normal(kx, (batch, in_size), jnp.float32)
    params = init_params(kp, in_size, out_size)

    ref = reference_forward(x, params)

    # Bit-fidelity path (f32 matmul operands) — checked against the un-fused
    # reference.  Small tolerance headroom for the (exact-in-infinite-precision)
    # fused Linear-Linear reassociation, which changes f32 rounding slightly.
    prep_f32, osz = prepare_params(params, matmul_dtype=jnp.float32)
    out = model1_forward(x, prep_f32["w12"], prep_f32["w34"], prep_f32["w5"],
                         prep_f32["vec"], out_size=osz)
    out = jax.block_until_ready(out)
    assert out.shape == (batch, out_size)
    assert jnp.allclose(out, ref, atol=2e-4, rtol=2e-4), "mismatch vs JAX reference"

    # Default fast path (bf16 matmul operands, f32 accumulation): native MXU
    # rate on v5e/v6e/v7x and half the weight DMA bytes.  Loose sanity check
    # only — bf16 is intentionally not bit-faithful to the f32 module.
    prep_bf16, _ = prepare_params(params)
    out_bf = model1_forward(x, prep_bf16["w12"], prep_bf16["w34"],
                            prep_bf16["w5"], prep_bf16["vec"], out_size=osz)
    out_bf = jax.block_until_ready(out_bf)
    assert out_bf.shape == (batch, out_size)
    assert bool(jnp.all(jnp.isfinite(out_bf)))
    assert jnp.allclose(out_bf, ref, atol=0.25, rtol=0.25), "bf16 path sanity check"

    print("KERNEL_OK")
</pallas_src>

<mosaic_0001>
module attributes {stable_mosaic.version = 11 : i64} {
  func.func @model1_kernel(%arg0: memref<8x32xf32, #tpu.memory_space<vmem>>, %arg1: memref<32x32xf32, #tpu.memory_space<vmem>>, %arg2: memref<32x32xf32, #tpu.memory_space<vmem>>, %arg3: memref<32x128xf32, #tpu.memory_space<vmem>>, %arg4: memref<8x128xf32, #tpu.memory_space<vmem>>, %arg5: memref<8x128xf32, #tpu.memory_space<vmem>>) attributes {dimension_semantics = [], scalar_prefetch = 0 : i64, scratch_operands = 0 : i64, tpu.core_type = #tpu.core_type<tc>} {
    %c0 = arith.constant 0 : index
    %c0_0 = arith.constant 0 : index
    %0 = vector.load %arg4[%c0, %c0_0] : memref<8x128xf32, #tpu.memory_space<vmem>>, vector<1x32xf32>
    %c1 = arith.constant 1 : index
    %c0_1 = arith.constant 0 : index
    %1 = vector.load %arg4[%c1, %c0_1] : memref<8x128xf32, #tpu.memory_space<vmem>>, vector<1x32xf32>
    %c2 = arith.constant 2 : index
    %c0_2 = arith.constant 0 : index
    %2 = vector.load %arg4[%c2, %c0_2] : memref<8x128xf32, #tpu.memory_space<vmem>>, vector<1x32xf32>
    %c3 = arith.constant 3 : index
    %c0_3 = arith.constant 0 : index
    %3 = vector.load %arg4[%c3, %c0_3] : memref<8x128xf32, #tpu.memory_space<vmem>>, vector<1x32xf32>
    %c4 = arith.constant 4 : index
    %c0_4 = arith.constant 0 : index
    %4 = vector.load %arg4[%c4, %c0_4] : memref<8x128xf32, #tpu.memory_space<vmem>>, vector<1x128xf32>
    %c0_5 = arith.constant 0 : index
    %c0_6 = arith.constant 0 : index
    %5 = vector.load %arg0[%c0_5, %c0_6] : memref<8x32xf32, #tpu.memory_space<vmem>>, vector<8x32xf32>
    %c0_7 = arith.constant 0 : index
    %c0_8 = arith.constant 0 : index
    %6 = vector.load %arg1[%c0_7, %c0_8] : memref<32x32xf32, #tpu.memory_space<vmem>>, vector<32x32xf32>
    %cst = arith.constant dense<0.000000e+00> : vector<8x32xf32>
    %7 = tpu.matmul %5, %6, %cst {dimension_numbers = #tpu.dot_dimension_numbers<[1], [0], [0], [1], [0, 0, 1, 1], [], []>} : vector<8x32xf32>, vector<32x32xf32>, vector<8x32xf32> -> vector<8x32xf32>
    %cst_9 = arith.constant dense<0.000000e+00> : vector<32xf32>
    %8 = vector.multi_reduction <add>, %7, %cst_9 [0] : vector<8x32xf32> to vector<32xf32>
    %9 = vector.shape_cast %8 : vector<32xf32> to vector<1x32xf32>
    %cst_10 = arith.constant 8.000000e+00 : f32
    %10 = vector.broadcast %cst_10 : f32 to vector<1x32xf32>
    %11 = arith.divf %9, %10 : vector<1x32xf32>
    %12 = vector.broadcast %11 : vector<1x32xf32> to vector<8x32xf32>
    %13 = arith.subf %7, %12 : vector<8x32xf32>
    %14 = arith.mulf %13, %13 : vector<8x32xf32>
    %cst_11 = arith.constant dense<0.000000e+00> : vector<32xf32>
    %15 = vector.multi_reduction <add>, %14, %cst_11 [0] : vector<8x32xf32> to vector<32xf32>
    %16 = vector.shape_cast %15 : vector<32xf32> to vector<1x32xf32>
    %cst_12 = arith.constant 8.000000e+00 : f32
    %17 = vector.broadcast %cst_12 : f32 to vector<1x32xf32>
    %18 = arith.divf %16, %17 : vector<1x32xf32>
    %cst_13 = arith.constant 9.99999974E-6 : f32
    %19 = vector.broadcast %cst_13 : f32 to vector<1x32xf32>
    %20 = arith.addf %18, %19 : vector<1x32xf32>
    %21 = math.rsqrt %20 : vector<1x32xf32>
    %22 = arith.mulf %0, %21 : vector<1x32xf32>
    %23 = arith.mulf %11, %22 : vector<1x32xf32>
    %24 = arith.subf %1, %23 : vector<1x32xf32>
    %25 = vector.broadcast %22 : vector<1x32xf32> to vector<8x32xf32>
    %26 = arith.mulf %7, %25 : vector<8x32xf32>
    %27 = vector.broadcast %24 : vector<1x32xf32> to vector<8x32xf32>
    %28 = arith.addf %26, %27 : vector<8x32xf32>
    %cst_14 = arith.constant 0.000000e+00 : f32
    %29 = vector.broadcast %cst_14 : f32 to vector<8x32xf32>
    %30 = arith.cmpf oge, %28, %29 : vector<8x32xf32>
    %cst_15 = arith.constant 0.00999999977 : f32
    %31 = vector.broadcast %cst_15 : f32 to vector<8x32xf32>
    %32 = arith.mulf %31, %28 : vector<8x32xf32>
    %33 = arith.select %30, %28, %32 : vector<8x32xi1>, vector<8x32xf32>
    %c0_16 = arith.constant 0 : index
    %c0_17 = arith.constant 0 : index
    %34 = vector.load %arg2[%c0_16, %c0_17] : memref<32x32xf32, #tpu.memory_space<vmem>>, vector<32x32xf32>
    %cst_18 = arith.constant dense<0.000000e+00> : vector<8x32xf32>
    %35 = tpu.matmul %33, %34, %cst_18 {dimension_numbers = #tpu.dot_dimension_numbers<[1], [0], [0], [1], [0, 0, 1, 1], [], []>} : vector<8x32xf32>, vector<32x32xf32>, vector<8x32xf32> -> vector<8x32xf32>
    %cst_19 = arith.constant dense<0.000000e+00> : vector<32xf32>
    %36 = vector.multi_reduction <add>, %35, %cst_19 [0] : vector<8x32xf32> to vector<32xf32>
    %37 = vector.shape_cast %36 : vector<32xf32> to vector<1x32xf32>
    %cst_20 = arith.constant 8.000000e+00 : f32
    %38 = vector.broadcast %cst_20 : f32 to vector<1x32xf32>
    %39 = arith.divf %37, %38 : vector<1x32xf32>
    %40 = vector.broadcast %39 : vector<1x32xf32> to vector<8x32xf32>
    %41 = arith.subf %35, %40 : vector<8x32xf32>
    %42 = arith.mulf %41, %41 : vector<8x32xf32>
    %cst_21 = arith.constant dense<0.000000e+00> : vector<32xf32>
    %43 = vector.multi_reduction <add>, %42, %cst_21 [0] : vector<8x32xf32> to vector<32xf32>
    %44 = vector.shape_cast %43 : vector<32xf32> to vector<1x32xf32>
    %cst_22 = arith.constant 8.000000e+00 : f32
    %45 = vector.broadcast %cst_22 : f32 to vector<1x32xf32>
    %46 = arith.divf %44, %45 : vector<1x32xf32>
    %cst_23 = arith.constant 9.99999974E-6 : f32
    %47 = vector.broadcast %cst_23 : f32 to vector<1x32xf32>
    %48 = arith.addf %46, %47 : vector<1x32xf32>
    %49 = math.rsqrt %48 : vector<1x32xf32>
    %50 = arith.mulf %2, %49 : vector<1x32xf32>
    %51 = arith.mulf %39, %50 : vector<1x32xf32>
    %52 = arith.subf %3, %51 : vector<1x32xf32>
    %53 = vector.broadcast %50 : vector<1x32xf32> to vector<8x32xf32>
    %54 = arith.mulf %35, %53 : vector<8x32xf32>
    %55 = vector.broadcast %52 : vector<1x32xf32> to vector<8x32xf32>
    %56 = arith.addf %54, %55 : vector<8x32xf32>
    %cst_24 = arith.constant 0.000000e+00 : f32
    %57 = vector.broadcast %cst_24 : f32 to vector<8x32xf32>
    %58 = arith.cmpf oge, %56, %57 : vector<8x32xf32>
    %cst_25 = arith.constant 0.00999999977 : f32
    %59 = vector.broadcast %cst_25 : f32 to vector<8x32xf32>
    %60 = arith.mulf %59, %56 : vector<8x32xf32>
    %61 = arith.select %58, %56, %60 : vector<8x32xi1>, vector<8x32xf32>
    %c0_26 = arith.constant 0 : index
    %c0_27 = arith.constant 0 : index
    %62 = vector.load %arg3[%c0_26, %c0_27] : memref<32x128xf32, #tpu.memory_space<vmem>>, vector<32x128xf32>
    %cst_28 = arith.constant dense<0.000000e+00> : vector<8x128xf32>
    %63 = tpu.matmul %61, %62, %cst_28 {dimension_numbers = #tpu.dot_dimension_numbers<[1], [0], [0], [1], [0, 0, 1, 1], [], []>} : vector<8x32xf32>, vector<32x128xf32>, vector<8x128xf32> -> vector<8x128xf32>
    %64 = vector.broadcast %4 : vector<1x128xf32> to vector<8x128xf32>
    %65 = arith.addf %63, %64 : vector<8x128xf32>
    %c0_29 = arith.constant 0 : index
    %c0_30 = arith.constant 0 : index
    %66 = vector.load %arg5[%c0_29, %c0_30] : memref<8x128xf32, #tpu.memory_space<vmem>>, vector<8x128xf32>
    tpu.vector_store %arg5[%c0_29, %c0_30], %65 {strides = array<i32>} : memref<8x128xf32, #tpu.memory_space<vmem>>, vector<8x128xf32>,
    return
  }
}

</mosaic_0001>

<bundles_post_ra>
// kernel: model1_forward.1
= control target key start
LH: loop header
LB: loop body
LE: loop exit
PB: predicated region body
PF: predicated region fallthrough
CT: control target
= control target key end

     0   :  { %10 = vsyncpa [#allocation3], 0  ;;  %s704_s0 = inlined_call_operand.hbm [shape: f32[8,32], index: 0, kind: input, shape index: {}]   ;;  %s705_s1 = inlined_call_operand.hbm [shape: f32[32,32], index: 1, kind: input, shape index: {}]   ;;  %s706_s2 = inlined_call_operand.hbm [shape: f32[32,32], index: 2, kind: input, shape index: {}]   ;;  %s707_s3 = inlined_call_operand.hbm [shape: f32[32,128], index: 3, kind: input, shape index: {}]   ;;  %s708_s4 = inlined_call_operand.hbm [shape: f32[8,128], index: 4, kind: input, shape index: {}]   ;;  %s709_s5 = inlined_call_operand.hbm [shape: f32[8,128], index: 5, kind: output, shape index: {}]  }
   0x1   :  { %11 = vsyncpa [#allocation6], 0 }
   0x2   :  { %12 = vsyncpa [#allocation9], 0 }
   0x3   :  { %13 = vsyncpa [#allocation4], 0  ;;  %s612_s18 = smov [#allocation5]  }
   0x4   :  { %s29_s19 = sshll.u32 %s612_s18, 4  ;;  %s30_s19 = int_to_ptr.vmem [resolvable:$true] %s29_s19 }
   0x5   :  { %s492_s20 = scalar_lea.vmem %s30_s19, 512  ;;  %p497_p1 = scmp.lt.s32.totalorder %s30_s19, %s30_s19 }
   0x6   :  { %p493_p0 = scmp.ne.s32.totalorder %s30_s19, %s492_s20  ;;  %p498_p2 = scmp.lt.s32.totalorder %s492_s20, %s492_s20 }
   0x8   :  { %p499_p3 = por %p498_p2, %p497_p1 }
   0xa   :  { %p500_p4 = pnand %p499_p3, %p493_p0 }
   0xc   :  { %503 = shalt.err (!%p500_p4)
}
   0xd   :  { %s613_s21 = smov 128   ;;  %s614_s22 = smov 8  }
   0xe   :  { %35 = dma.hbm_to_vmem [thread:$0]  %s705_s1, 512, %s30_s19, [#allocation6], %s613_s21, %s613_s21, %s614_s22  }
   0xf   :  { %s615_s25 = smov [#allocation8]   ;;  %s616_s27 = smov [#allocation2]  }
  0x10   :  { %s53_s26 = sshll.u32 %s615_s25, 4  ;;  %s20_s28 = sshll.u32 %s616_s27, 4  ;;  %s54_s26 = int_to_ptr.vmem [resolvable:$true] %s53_s26  ;;  %s21_s28 = int_to_ptr.vmem [resolvable:$true] %s20_s28 }
  0x11   :  { %s512_s29 = scalar_lea.vmem %s54_s26, 512  ;;  %p517_p6 = scmp.lt.s32.totalorder %s54_s26, %s54_s26 }
  0x12   :  { %p513_p5 = scmp.ne.s32.totalorder %s54_s26, %s512_s29  ;;  %p518_p7 = scmp.lt.s32.totalorder %s512_s29, %s512_s29 }
  0x14   :  { %p519_p8 = por %p518_p7, %p517_p6 }
  0x16   :  { %p520_p9 = pnand %p519_p8, %p513_p5 }
  0x18   :  { %523 = shalt.err (!%p520_p9)
}
  0x19   :  { %59 = dma.hbm_to_vmem [thread:$0]  %s707_s3, 512, %s54_s26, [#allocation9], %s613_s21, %s613_s21, %s614_s22  }
  0x1a   :  { %s532_s1 = scalar_lea.vmem %s21_s28, 128  ;;  %p537_p11 = scmp.lt.s32.totalorder %s21_s28, %s21_s28 }
  0x1b   :  { %p533_p10 = scmp.ne.s32.totalorder %s21_s28, %s532_s1  ;;  %p538_p12 = scmp.lt.s32.totalorder %s532_s1, %s532_s1 }
  0x1d   :  { %p539_p13 = por %p538_p12, %p537_p11 }
  0x1f   :  { %p540_p0 = pnand %p539_p13, %p533_p10 }
  0x21   :  { %543 = shalt.err (!%p540_p0)
}
  0x22   :  { %23 = dma.hbm_to_vmem [thread:$0]  %s704_s0, 128, %s21_s28, [#allocation3]  }
  0x23   :  { %s617_s9 = smov [#allocation7]   ;;  %s618_s11 = smov [#allocation10]  }
  0x24   :  { %s41_s10 = sshll.u32 %s617_s9, 4  ;;  %s66_s12 = sshll.u32 %s618_s11, 4  ;;  %s42_s10 = int_to_ptr.vmem [resolvable:$true] %s41_s10  ;;  %s67_s12 = int_to_ptr.vmem [resolvable:$true] %s66_s12 }
  0x25   :  { %s552_s13 = scalar_lea.vmem %s42_s10, 512  ;;  %p557_p2 = scmp.lt.s32.totalorder %s42_s10, %s42_s10 }
  0x26   :  { %p553_p1 = scmp.ne.s32.totalorder %s42_s10, %s552_s13  ;;  %p558_p3 = scmp.lt.s32.totalorder %s552_s13, %s552_s13 }
  0x28   :  { %p559_p4 = por %p558_p3, %p557_p2 }
  0x2a   :  { %p560_p5 = pnand %p559_p4, %p553_p1 }
  0x2c   :  { %563 = shalt.err (!%p560_p5)
}
  0x2d   :  { %47 = dma.hbm_to_vmem [thread:$0]  %s706_s2, 512, %s42_s10, [#allocation6], %s613_s21, %s613_s21, %s614_s22  }
  0x2e   :  { %s572_s0 = scalar_lea.vmem %s67_s12, 128  ;;  %p577_p7 = scmp.lt.s32.totalorder %s67_s12, %s67_s12 }
  0x2f   :  { %p573_p6 = scmp.ne.s32.totalorder %s67_s12, %s572_s0  ;;  %p578_p8 = scmp.lt.s32.totalorder %s572_s0, %s572_s0 }
  0x31   :  { %p579_p9 = por %p578_p8, %p577_p7 }
  0x33   :  { %p580_p10 = pnand %p579_p9, %p573_p6 }
  0x35   :  { %583 = shalt.err (!%p580_p10)
}
  0x36   :  { %69 = dma.hbm_to_vmem [thread:$0]  %s708_s4, 128, %s67_s12, [#allocation9]  }
  0x37   :  { %604 = dma.done.wait [#allocation3], 128  }
  0x38   :  { %605 = vsyncadd [#allocation3], 4294967168 }
  0x39   :  { %606 = dma.done.wait [#allocation6], 1024  }
  0x3a   :  { %607 = vsyncadd [#allocation6], 4294966272 }
  0x3b   :  { %608 = dma.done.wait [#allocation9], 640  }
  0x3c   :  { %609 = vsyncadd [#allocation9], 4294966656  ;;  %v619_v0 = vmov 0.0   ;;  %vm620_vm0 = vmmov 0   ;;  %v94_v1 = vld [vmem:[#allocation5 + $0x18] sm:$0xff]  ;;  %v93_v2 = vld [vmem:[#allocation5 + $0x10] sm:$0xff]  ;;  %v193_v31 = vlaneseq }
  0x3d   :  { %437 = vmatprep.subr.mxu0 %v619_v0  ;;  %445 = vmatprep.mubr.msk.f32.mxu0 %vm620_vm0, %v619_v0  ;;  %v92_v3 = vld [vmem:[#allocation5 + $0x8] sm:$0xff]  ;;  %v91_v4 = vld [vmem:[#allocation5] sm:$0xff]  ;;  %v90_v5 = vld [vmem:[#allocation2] sm:$0xff]  ;;  %vm95_vm1 = vcmask 261120   ;;  %s621_s2 = smov [#allocation11]  }
  0x3e   :  { %448 = vmatprep.subr.mxu1 %v619_v0  ;;  %456 = vmatprep.mubr.msk.f32.mxu1 %vm620_vm0, %v619_v0  ;;  %v209_v6 = vld [vmem:[#allocation7 + $0x18] sm:$0xff]  ;;  %v208_v7 = vld [vmem:[#allocation7 + $0x10] sm:$0xff]  ;;  %v207_v8 = vld [vmem:[#allocation7 + $0x8] sm:$0xff]  ;;  %v194_v32 = vshrl.u32 %v193_v31, 7  ;;  %s407_s4 = sshll.u32 %s621_s2, 4  ;;  %s408_s4 = int_to_ptr.vmem [resolvable:$true] %s407_s4 }
  0x3f   :  { %438 = vmatpush3.msra.mxu0 %v94_v1  ;;  %449 = vmatpush3.msra.mxu1 %v209_v6  ;;  %v206_v9 = vld [vmem:[#allocation7] sm:$0xff]  ;;  %v322_v46 = vld [vmem:[#allocation8 + $0x18] sm:$0xff]  ;;  %v321_v47 = vld [vmem:[#allocation8 + $0x10] sm:$0xff]  ;;  %s584_s17 = scalar_lea.vmem %s408_s4, 128  ;;  %p589_p12 = scmp.lt.s32.totalorder %s408_s4, %s408_s4 }
  0x40   :  { %439 = vmatprep.subr.mxu0 %v619_v0  ;;  %450 = vmatprep.subr.mxu1 %v619_v0  ;;  %v85_v33 = vld [vmem:[#allocation10] sm:$0x1]  ;;  %v195_v34 = vsub.s32 0, %v194_v32  ;;  %v86_v37 = vld [vmem:[#allocation10 + $0x1] sm:$0x1]  ;;  %v320_v48 = vld [vmem:[#allocation8 + $0x8] sm:$0xff]  ;;  %p585_p11 = scmp.ne.s32.totalorder %s408_s4, %s584_s17  ;;  %p590_p13 = scmp.lt.s32.totalorder %s584_s17, %s584_s17 }
  0x41   :  { %440 = vmatpush3.msra.mxu0 %v93_v2  ;;  %451 = vmatpush3.msra.mxu1 %v208_v7  ;;  %v319_v49 = vld [vmem:[#allocation8] sm:$0xff] }
  0x42   :  { %441 = vmatprep.subr.mxu0 %v619_v0  ;;  %452 = vmatprep.subr.mxu1 %v619_v0  ;;  %v87_v7 = vld [vmem:[#allocation10 + $0x2] sm:$0x1]  ;;  %p591_p0 = por %p590_p13, %p589_p12 }
  0x43   :  { %442 = vmatpush3.msra.mxu0 %v92_v3  ;;  %453 = vmatpush3.msra.mxu1 %v207_v8 }
  0x44   :  { %443 = vmatprep.subr.mxu0 %v619_v0  ;;  %454 = vmatprep.subr.mxu1 %v619_v0  ;;  %p592_p1 = pnand %p591_p0, %p585_p11 }
  0x45   :  { %444 = vmatpush3.msra.mxu0 %v91_v4  ;;  %455 = vmatpush3.msra.mxu1 %v206_v9 }
  0x46   :  { %446 = vmatmul.mubr.msk.f32.vlgmr.msra.gmra.mxu0 %vm95_vm1, %v90_v5  ;;  %459 = vmatprep.subr.mxu0 %v619_v0 }
  0x47   :  { %467 = vmatprep.mubr.msk.f32.mxu0 %vm620_vm0, %v619_v0  ;;  %460 = vmatpush3.msra.mxu0 %v322_v46 }
  0x48   :  { %461 = vmatprep.subr.mxu0 %v619_v0 }
  0x49   :  { %462 = vmatpush3.msra.mxu0 %v321_v47 }
  0x4a   :  { %463 = vmatprep.subr.mxu0 %v619_v0 }
  0x4b   :  { %464 = vmatpush3.msra.mxu0 %v320_v48 }
  0x4c   :  { %465 = vmatprep.subr.mxu0 %v619_v0 }
  0x4d   :  { %466 = vmatpush3.msra.mxu0 %v319_v49 }
 0x106   :  { %v165_v10 = vpop.f32.mrf.mxu0 }
 0x107   :  { %v169_v11 = vsel %vm95_vm1, %v165_v10, 0.0 }
 0x108   :  { %v170_v12 = vrot.slane %v169_v11, 4  ;;  %v447_v13 = vpop.f32.mrf.mxu0 }
 0x10a   :  { %v171_v14 = vadd.f32 %v170_v12, %v169_v11 }
 0x10c   :  { %v172_v15 = vrot.slane %v171_v14, 2 }
 0x10e   :  { %v173_v16 = vadd.f32 %v172_v15, %v171_v14 }
 0x110   :  { %v174_v17 = vrot.slane %v173_v16, 1 }
 0x112   :  { %v175_v18 = vadd.f32 %v174_v17, %v173_v16 }
 0x114   :  { %v177_v19 = vmul.f32 0.125, %v175_v18 }
 0x116   :  { %v178_v20 = vsub.f32 %v165_v10, %v177_v19 }
 0x118   :  { %v179_v21 = vmul.f32 %v178_v20, %v178_v20 }
 0x11a   :  { %v180_v22 = vsel %vm95_vm1, %v179_v21, 0.0 }
 0x11b   :  { %v181_v23 = vrot.slane %v180_v22, 4 }
 0x11d   :  { %v182_v24 = vadd.f32 %v181_v23, %v180_v22 }
 0x11f   :  { %v183_v25 = vrot.slane %v182_v24, 2 }
 0x121   :  { %v184_v26 = vadd.f32 %v183_v25, %v182_v24 }
 0x123   :  { %v185_v27 = vrot.slane %v184_v26, 1 }
 0x125   :  { %v186_v28 = vadd.f32 %v185_v27, %v184_v26 }
 0x127   :  { %v187_v29 = vmul.f32 0.125, %v186_v28 }
 0x129   :  { %v188_v30 = vadd.f32 1e-05, %v187_v29 }
 0x12b   :  { %480 = vrsqrt.f32 %v188_v30 }
 0x138   :  { %v481_v35 = vpop.eup %480 }
 0x139   :  { %v190_v36 = vmul.f32 %v481_v35, %v85_v33 }
 0x13b   :  { %v191_v38 = vmul.f32 %v190_v36, %v177_v19  ;;  %v196_v39 = vrot.slane %v190_v36, %v195_v34  ;;  %v420_v19 = vld [vmem:[#allocation10 + $0x4] ss:$0 sm:$0xff] }
 0x13d   :  { %v192_v40 = vsub.f32 %v86_v37, %v191_v38  ;;  %v197_v41 = vmul.f32 %v196_v39, %v165_v10  ;;  %v88_v10 = vld [vmem:[#allocation10 + $0x3] sm:$0x1] }
 0x13f   :  { %v201_v42 = vrot.slane %v192_v40, %v195_v34 }
 0x141   :  { %v202_v43 = vadd.f32 %v201_v42, %v197_v41 }
 0x143   :  { %vm203_vm2 = vcmp.ge.f32.partialorder %v202_v43, 0.0  ;;  %v204_v44 = vmul.f32 0.01, %v202_v43 }
 0x145   :  { %v205_v45 = vsel %vm203_vm2, %v202_v43, %v204_v44 }
 0x146   :  { %457 = vmatmul.mubr.msk.f32.vlgmr.msra.gmra.mxu1 %vm95_vm1, %v205_v45 }
 0x206   :  { %v279_v50 = vpop.f32.mrf.mxu1 }
 0x207   :  { %v283_v51 = vsel %vm95_vm1, %v279_v50, 0.0 }
 0x208   :  { %v284_v52 = vrot.slane %v283_v51, 4  ;;  %v458_v53 = vpop.f32.mrf.mxu1 }
 0x20a   :  { %v285_v54 = vadd.f32 %v284_v52, %v283_v51 }
 0x20c   :  { %v286_v55 = vrot.slane %v285_v54, 2 }
 0x20e   :  { %v287_v56 = vadd.f32 %v286_v55, %v285_v54 }
 0x210   :  { %v288_v57 = vrot.slane %v287_v56, 1 }
 0x212   :  { %v289_v58 = vadd.f32 %v288_v57, %v287_v56 }
 0x214   :  { %v290_v59 = vmul.f32 0.125, %v289_v58 }
 0x216   :  { %v291_v60 = vsub.f32 %v279_v50, %v290_v59 }
 0x218   :  { %v292_v61 = vmul.f32 %v291_v60, %v291_v60 }
 0x21a   :  { %v293_v62 = vsel %vm95_vm1, %v292_v61, 0.0 }
 0x21b   :  { %v294_v63 = vrot.slane %v293_v62, 4 }
 0x21d   :  { %v295_v1 = vadd.f32 %v294_v63, %v293_v62 }
 0x21f   :  { %v296_v2 = vrot.slane %v295_v1, 2 }
 0x221   :  { %v297_v0 = vadd.f32 %v296_v2, %v295_v1 }
 0x223   :  { %v298_v3 = vrot.slane %v297_v0, 1 }
 0x225   :  { %v299_v4 = vadd.f32 %v298_v3, %v297_v0 }
 0x227   :  { %v300_v5 = vmul.f32 0.125, %v299_v4 }
 0x229   :  { %v301_v6 = vadd.f32 1e-05, %v300_v5 }
 0x22b   :  { %482 = vrsqrt.f32 %v301_v6 }
 0x238   :  { %v483_v8 = vpop.eup %482 }
 0x239   :  { %v303_v9 = vmul.f32 %v483_v8, %v87_v7 }
 0x23b   :  { %v304_v11 = vmul.f32 %v303_v9, %v290_v59  ;;  %v309_v12 = vrot.slane %v303_v9, %v195_v34 }
 0x23d   :  { %v305_v13 = vsub.f32 %v88_v10, %v304_v11  ;;  %v310_v14 = vmul.f32 %v309_v12, %v279_v50 }
 0x23f   :  { %v314_v15 = vrot.slane %v305_v13, %v195_v34 }
 0x241   :  { %v315_v16 = vadd.f32 %v314_v15, %v310_v14 }
 0x243   :  { %v317_v17 = vmul.f32 0.01, %v315_v16  ;;  %vm316_vm3 = vcmp.ge.f32.partialorder %v315_v16, 0.0 }
 0x245   :  { %v318_v18 = vsel %vm316_vm3, %v315_v16, %v317_v17 }
 0x246   :  { %468 = vmatmul.mubr.msk.f32.vlgmr.msra.gmra.mxu0 %vm95_vm1, %v318_v18 }
 0x306   :  { %v396_v20 = vpop.f32.mrf.mxu0 }
 0x307   :  { %v397_v21 = vadd.f32 %v420_v19, %v396_v20 }
 0x308   :  { %v469_v22 = vpop.f32.mrf.mxu0 }
 0x309   :  { %400 = vst [vmem:[#allocation11] sm:$0xff] %v397_v21 }
 0x30a   :  { %595 = shalt.err (!%p592_p1)
}
 0x30b   :  { %410 = dma.vmem_to_hbm [thread:$0]  %s408_s4, 128, %s709_s5, [#allocation4]  }
 0x30c   :  { %610 = dma.done.wait [#allocation4], 128  }
 0x30d   :  { %611 = vsyncadd [#allocation4], 4294967168 }
 0x30e   :  { %414 = vsyncpa [#allocation3], 1 }
 0x30f   :  { %415 = vsyncpa [#allocation6], 1 }
 0x310   :  { %416 = vsyncpa [#allocation9], 1 }
 0x311   :  { %417 = vsyncpa [#allocation4], 1 }

</bundles_post_ra>
